<compile_context>
chip_gen: v7x
topology: tpu7x:2x2x1
jax: 0.10.0
libtpu: 0.0.40
codegen_flags: <defaults>
</compile_context>

<pallas_src>
import functools

import jax
import jax.numpy as jnp
from jax.experimental import pallas as pl
from jax.experimental.pallas import tpu as pltpu


def _cdiv(a, b):
    return -(-a // b)


def _round_up(n, m):
    return ((n + m - 1) // m) * m


def _vmem_capacity_bytes():
    """Physical VMEM of the current chip (per TensorCore); defensive fallback."""
    try:
        info = pltpu.get_tpu_info()
        cap = getattr(info, "vmem_capacity_bytes", None)
        if cap:
            return int(cap)
    except Exception:
        pass
    return 128 << 20  # v5e / v6e


def _tensorcores_per_chip():
    """Best-effort detection of multi-TC chips (v7x / megacore)."""
    try:
        dev = jax.devices()[0]
        nc = getattr(dev, "num_cores", None)
        if nc:
            return int(nc)
        kind = str(getattr(dev, "device_kind", "")).lower()
        if "v7" in kind or "v4" in kind or "v5p" in kind:
            return 2
    except Exception:
        pass
    return 1


def highway_kernel(x_ref, w_ref, b_ref, o_ref, *, hp, block_n):
    """One (batch tile, feature tile) step of the fused highway layer.

    x_ref: (block_b, Hp)        x dtype (f32 or bf16)
    w_ref: (2, Hp, block_n)     bf16   -- [Wp_cols | Wt_cols] for this feature block
    b_ref: (2, 1, block_n)      f32    -- [bp_cols | bt_cols]
    o_ref: (block_b, block_n)   out dtype
    """
    x = x_ref[...]
    xm = x.astype(w_ref.dtype)  # MXU operand dtype (bf16), f32 accumulation below.
    proj = jnp.dot(xm, w_ref[0], preferred_element_type=jnp.float32) + b_ref[0]
    gate = jnp.dot(xm, w_ref[1], preferred_element_type=jnp.float32) + b_ref[1]
    proj = jnp.maximum(proj, 0.0)        # relu(proj branch)
    gate = jax.nn.sigmoid(gate)          # transform gate (EUP exp + recip)
    if block_n == hp:
        xr = x.astype(jnp.float32)
    else:
        # Lane-aligned residual slice of x for this feature block.
        off = pl.multiple_of(pl.program_id(1) * block_n, 128)
        xr = x_ref[:, pl.ds(off, block_n)].astype(jnp.float32)
    # gate*proj + (1-gate)*x  ==  gate*(proj - x) + x
    o_ref[...] = (gate * (proj - xr) + xr).astype(o_ref.dtype)


def _select_tiles(B, Hp, x_isz, w_isz, o_isz, block_b_target, budget, multi_tc,
                  max_block_n):
    """Pick (block_b, block_n) and return the matching VMEM estimate."""
    # --- feature tile: full Hp unless the resident fused weights blow the budget.
    cand = [n for n in range(Hp, 127, -128) if Hp % n == 0]
    if max_block_n is not None:
        cand = [n for n in cand if n <= max_block_n] or [cand[-1]]
    block_n = cand[-1]
    for n in cand:
        nf = Hp // n
        w_bufs = 1 if nf == 1 else 2
        need = (w_bufs * 2 * Hp * n * w_isz       # weight blocks
                + 2 * 8 * Hp * x_isz              # minimal x tiles (double-buffered)
                + 2 * 8 * n * o_isz               # minimal out tiles
                + 8 * Hp * 2 + 4 * 8 * n * 4      # intermediates at minimal tile
                + (2 << 20))
        if need <= budget:
            block_n = n
            break
    nf = Hp // block_n
    w_bufs = 1 if nf == 1 else 2

    # --- batch tile: big target, ragged-aware, shrink-to-fit.
    block_b = max(8, min(_round_up(block_b_target, 8), _round_up(B, 8)))
    n_tiles = max(1, _cdiv(B, block_b))
    block_b = _round_up(_cdiv(B, n_tiles), 8)   # keeps tail-tile padding < 8 rows

    def vmem_need(bb):
        return (2 * bb * Hp * x_isz               # x tile, double-buffered
                + 2 * bb * block_n * o_isz        # out tile, double-buffered
                + w_bufs * 2 * Hp * block_n * w_isz
                + w_bufs * 2 * block_n * 4        # bias
                + bb * Hp * 2                     # bf16 matmul operand copy
                + 4 * bb * block_n * 4            # f32 proj/gate/resid/epilogue temps
                + (2 << 20))                      # headroom

    while block_b > 8 and vmem_need(block_b) > budget:
        block_b = max(8, _round_up(block_b // 2, 8))

    # Multi-TC chips (v7x): guarantee >= 2 parallel grid steps so both cores work.
    if multi_tc and _cdiv(B, block_b) * nf < 2 and B >= 16:
        block_b = _round_up(_cdiv(B, 2), 8)

    return block_b, block_n, vmem_need(block_b)


@functools.partial(jax.jit, static_argnames=("block_b", "max_block_n", "out_dtype"))
def highway(x, w_fused, b_fused, *, block_b=512, max_block_n=None, out_dtype=None):
    """x: (..., H). w_fused: (2, Hp, Hp) bf16. b_fused: (2, 1, Hp) f32."""
    orig_shape = x.shape
    H = orig_shape[-1]
    if x.ndim != 2:
        x = x.reshape(-1, H)
    B = x.shape[0]

    Hp = w_fused.shape[1]
    assert w_fused.shape == (2, Hp, Hp)
    assert b_fused.shape == (2, 1, Hp)
    assert Hp % 128 == 0 and Hp >= H

    out_dtype = x.dtype if out_dtype is None else jnp.dtype(out_dtype)
    x_isz = jnp.dtype(x.dtype).itemsize
    w_isz = jnp.dtype(w_fused.dtype).itemsize
    o_isz = jnp.dtype(out_dtype).itemsize

    cap = _vmem_capacity_bytes()
    budget = max(16 << 20, cap - (8 << 20))        # gen-aware: ~56 MiB on v7x
    multi_tc = _tensorcores_per_chip() >= 2

    bb, bn, vmem_need = _select_tiles(B, Hp, x_isz, w_isz, o_isz,
                                      block_b, budget, multi_tc, max_block_n)
    nf = Hp // bn
    Bp = _round_up(B, bb)

    xp = x
    if Hp != H or Bp != B:
        xp = jnp.pad(x, ((0, Bp - B), (0, Hp - H)))

    grid = (Bp // bb, nf)

    # Grid-invariant weights/bias (nf == 1): single-buffer them to save VMEM.
    const_kwargs = {"pipeline_mode": pl.Buffered(1)} if nf == 1 else {}
    in_specs = [
        pl.BlockSpec((bb, Hp), lambda i, j: (i, 0)),                     # x tile
        pl.BlockSpec((2, Hp, bn), lambda i, j: (0, 0, j), **const_kwargs),  # weights
        pl.BlockSpec((2, 1, bn), lambda i, j: (0, 0, j), **const_kwargs),   # bias
    ]
    out_specs = pl.BlockSpec((bb, bn), lambda i, j: (i, j))

    cost = pl.CostEstimate(
        flops=4 * Bp * Hp * Hp,                       # (Bp,Hp) @ (Hp,2Hp)
        transcendentals=Bp * Hp,                      # sigmoid gate
        bytes_accessed=(Bp * Hp * x_isz + Bp * Hp * o_isz
                        + 2 * Hp * Hp * w_isz + 2 * Hp * 4),
    )

    compiler_kwargs = dict(dimension_semantics=("parallel", "parallel"))
    if vmem_need > (16 << 20):
        compiler_kwargs["vmem_limit_bytes"] = int(min(max(vmem_need, 32 << 20), budget))

    out = pl.pallas_call(
        functools.partial(highway_kernel, hp=Hp, block_n=bn),
        out_shape=jax.ShapeDtypeStruct((Bp, Hp), out_dtype),
        grid_spec=pltpu.PrefetchScalarGridSpec(
            num_scalar_prefetch=0,
            grid=grid,
            in_specs=in_specs,
            out_specs=out_specs,
        ),
        compiler_params=pltpu.CompilerParams(**compiler_kwargs),
        cost_estimate=cost,
    )(xp, w_fused, b_fused)

    if Hp != H or Bp != B:
        out = out[:B, :H]
    return out.reshape(orig_shape[:-1] + (H,))


def fuse_highway_params(wp_t, bp, wt_t, bt, *, weight_dtype=jnp.bfloat16):
    """Pack Wp/Wt -> (2, Hp, Hp) and bp/bt -> (2, 1, Hp), padded to 128 lanes.

    wp_t / wt_t: (H, H) pre-transposed (in, out) weights; bp / bt: (1, H).
    Weights are stored in bf16 (MXU-native); biases stay f32 (added post-dot).
    """
    H = wp_t.shape[0]
    Hp = _round_up(H, 128)
    # TODO(synk): if the caller controls hidden size, prefer Hp % 256 == 0 so the
    # matmul K dim fills the 256-wide MXU on v6e/v7x once the kernel is MXU-bound.
    pad_w = lambda w: jnp.pad(w, ((0, Hp - H), (0, Hp - H)))
    pad_b = lambda b: jnp.pad(b, ((0, 0), (0, Hp - H)))
    w_fused = jnp.stack([pad_w(wp_t), pad_w(wt_t)], axis=0).astype(weight_dtype)
    b_fused = jnp.stack([pad_b(bp), pad_b(bt)], axis=0).astype(jnp.float32)
    return w_fused, b_fused


def init_highway_params(key, input_size):
    """Deterministic init mirroring nn.Linear defaults; transform bias = -2.0."""
    kp_w, kp_b, kt_w = jax.random.split(key, 3)
    bound = 1.0 / jnp.sqrt(jnp.float32(input_size))
    # PyTorch Linear weight is (out, in); we store its transpose (in, out).
    wp = jax.random.uniform(kp_w, (input_size, input_size), jnp.float32, -bound, bound)
    bp = jax.random.uniform(kp_b, (1, input_size), jnp.float32, -bound, bound)
    wt = jax.random.uniform(kt_w, (input_size, input_size), jnp.float32, -bound, bound)
    bt = jnp.full((1, input_size), -2.0, dtype=jnp.float32)  # .bias.data.fill_(-2.0)
    return wp, bp, wt, bt


def highway_ref(x, wp_t, bp, wt_t, bt):
    proj = jax.nn.relu(x @ wp_t + bp)
    gate = jax.nn.sigmoid(x @ wt_t + bt)
    return gate * proj + (1.0 - gate) * x


if __name__ == "__main__":
    key = jax.random.PRNGKey(0)
    k_x, k_p, k_x2, k_p2 = jax.random.split(key, 4)

    # Case 1: common small case — single feature block, grid-invariant weights
    # single-buffered (Buffered(1) path).
    batch, hidden = 16, 128
    x = jax.random.normal(k_x, (batch, hidden), dtype=jnp.float32)
    wp_t, bp, wt_t, bt = init_highway_params(k_p, hidden)
    w_fused, b_fused = fuse_highway_params(wp_t, bp, wt_t, bt)
    out = jax.block_until_ready(highway(x, w_fused, b_fused))
    ref = highway_ref(x, wp_t, bp, wt_t, bt)
    assert out.shape == (batch, hidden)
    # bf16 MXU operands with f32 accumulation -> ~1e-2 relative error budget.
    assert jnp.allclose(out, ref, atol=3e-2, rtol=3e-2), "case1 mismatch vs reference"

    # Case 2: exercise the feature-tiled path (nf=2), multiple batch tiles, and
    # ragged-batch padding (B=20 with 8-row tiles).
    batch2, hidden2 = 20, 256
    x2 = jax.random.normal(k_x2, (batch2, hidden2), dtype=jnp.float32)
    wp2, bp2, wt2, bt2 = init_highway_params(k_p2, hidden2)
    w2, b2 = fuse_highway_params(wp2, bp2, wt2, bt2)
    out2 = jax.block_until_ready(highway(x2, w2, b2, block_b=8, max_block_n=128))
    ref2 = highway_ref(x2, wp2, bp2, wt2, bt2)
    assert out2.shape == (batch2, hidden2)
    assert jnp.allclose(out2, ref2, atol=3e-2, rtol=3e-2), "case2 mismatch vs reference"

    print("KERNEL_OK")
</pallas_src>

<mosaic_0001>
module attributes {stable_mosaic.version = 11 : i64} {
  func.func @highway_kernel(%arg0: i32, %arg1: i32, %arg2: memref<16x128xf32, #tpu.memory_space<vmem>>, %arg3: memref<2x128x128xbf16, #tpu.memory_space<vmem>>, %arg4: memref<2x1x128xf32, #tpu.memory_space<vmem>>, %arg5: memref<16x128xf32, #tpu.memory_space<vmem>>) attributes {dimension_semantics = [#tpu.dimension_semantics<parallel>, #tpu.dimension_semantics<parallel>], iteration_bounds = array<i64: 1, 1>, scalar_prefetch = 0 : i64, scratch_operands = 0 : i64, tpu.core_type = #tpu.core_type<tc>, window_params = [{transform_indices = @transform_0, window_bounds = array<i64: 16, 128>}, {pipeline_mode = #tpu.pipeline_mode<synchronous>, transform_indices = @transform_1, window_bounds = array<i64: 2, 128, 128>}, {pipeline_mode = #tpu.pipeline_mode<synchronous>, transform_indices = @transform_2, window_bounds = array<i64: 2, 1, 128>}, {transform_indices = @transform_3, window_bounds = array<i64: 16, 128>}]} {
    %c0 = arith.constant 0 : index
    %c0_0 = arith.constant 0 : index
    %0 = vector.load %arg2[%c0, %c0_0] : memref<16x128xf32, #tpu.memory_space<vmem>>, vector<16x128xf32>
    %1 = arith.truncf %0 : vector<16x128xf32> to vector<16x128xbf16>
    %c0_1 = arith.constant 0 : index
    %c0_2 = arith.constant 0 : index
    %c0_3 = arith.constant 0 : index
    %2 = vector.load %arg3[%c0_1, %c0_2, %c0_3] : memref<2x128x128xbf16, #tpu.memory_space<vmem>>, vector<1x128x128xbf16>
    %3 = vector.shape_cast %2 : vector<1x128x128xbf16> to vector<128x128xbf16>
    %cst = arith.constant dense<0.000000e+00> : vector<16x128xf32>
    %4 = tpu.matmul %1, %3, %cst {dimension_numbers = #tpu.dot_dimension_numbers<[1], [0], [0], [1], [0, 0, 1, 1], [], []>} : vector<16x128xbf16>, vector<128x128xbf16>, vector<16x128xf32> -> vector<16x128xf32>
    %c0_4 = arith.constant 0 : index
    %c0_5 = arith.constant 0 : index
    %c0_6 = arith.constant 0 : index
    %5 = vector.load %arg4[%c0_4, %c0_5, %c0_6] : memref<2x1x128xf32, #tpu.memory_space<vmem>>, vector<1x1x128xf32>
    %6 = vector.shape_cast %5 : vector<1x1x128xf32> to vector<1x128xf32>
    %7 = vector.broadcast %6 : vector<1x128xf32> to vector<16x128xf32>
    %8 = arith.addf %4, %7 : vector<16x128xf32>
    %c1 = arith.constant 1 : index
    %c0_7 = arith.constant 0 : index
    %c0_8 = arith.constant 0 : index
    %9 = vector.load %arg3[%c1, %c0_7, %c0_8] : memref<2x128x128xbf16, #tpu.memory_space<vmem>>, vector<1x128x128xbf16>
    %10 = vector.shape_cast %9 : vector<1x128x128xbf16> to vector<128x128xbf16>
    %cst_9 = arith.constant dense<0.000000e+00> : vector<16x128xf32>
    %11 = tpu.matmul %1, %10, %cst_9 {dimension_numbers = #tpu.dot_dimension_numbers<[1], [0], [0], [1], [0, 0, 1, 1], [], []>} : vector<16x128xbf16>, vector<128x128xbf16>, vector<16x128xf32> -> vector<16x128xf32>
    %c1_10 = arith.constant 1 : index
    %c0_11 = arith.constant 0 : index
    %c0_12 = arith.constant 0 : index
    %12 = vector.load %arg4[%c1_10, %c0_11, %c0_12] : memref<2x1x128xf32, #tpu.memory_space<vmem>>, vector<1x1x128xf32>
    %13 = vector.shape_cast %12 : vector<1x1x128xf32> to vector<1x128xf32>
    %14 = vector.broadcast %13 : vector<1x128xf32> to vector<16x128xf32>
    %15 = arith.addf %11, %14 : vector<16x128xf32>
    %cst_13 = arith.constant 0.000000e+00 : f32
    %16 = vector.broadcast %cst_13 : f32 to vector<16x128xf32>
    %17 = arith.maximumf %8, %16 : vector<16x128xf32>
    %18 = arith.negf %15 : vector<16x128xf32>
    %19 = math.exp %18 : vector<16x128xf32>
    %cst_14 = arith.constant 1.000000e+00 : f32
    %20 = vector.broadcast %cst_14 : f32 to vector<16x128xf32>
    %21 = arith.addf %20, %19 : vector<16x128xf32>
    %22 = arith.divf %20, %21 : vector<16x128xf32>
    %23 = arith.subf %17, %0 : vector<16x128xf32>
    %24 = arith.mulf %22, %23 : vector<16x128xf32>
    %25 = arith.addf %24, %0 : vector<16x128xf32>
    %c0_15 = arith.constant 0 : index
    %c0_16 = arith.constant 0 : index
    %26 = vector.load %arg5[%c0_15, %c0_16] : memref<16x128xf32, #tpu.memory_space<vmem>>, vector<16x128xf32>
    tpu.vector_store %arg5[%c0_15, %c0_16], %25 {strides = array<i32>} : memref<16x128xf32, #tpu.memory_space<vmem>>, vector<16x128xf32>,
    return
  }
  func.func @transform_0(%arg0: i32, %arg1: i32) -> (i32, i32) {
    %c0_i32 = arith.constant 0 : i32
    %c0_i32_0 = arith.constant 0 : i32
    return %arg0, %c0_i32 : i32, i32
  }
  func.func @transform_1(%arg0: i32, %arg1: i32) -> (i32, i32, i32) {
    %c0_i32 = arith.constant 0 : i32
    %c0_i32_0 = arith.constant 0 : i32
    %c0_i32_1 = arith.constant 0 : i32
    return %c0_i32, %c0_i32_0, %arg1 : i32, i32, i32
  }
  func.func @transform_2(%arg0: i32, %arg1: i32) -> (i32, i32, i32) {
    %c0_i32 = arith.constant 0 : i32
    %c0_i32_0 = arith.constant 0 : i32
    %c0_i32_1 = arith.constant 0 : i32
    return %c0_i32, %c0_i32_0, %arg1 : i32, i32, i32
  }
  func.func @transform_3(%arg0: i32, %arg1: i32) -> (i32, i32) {
    %c0_i32 = arith.constant 0 : i32
    return %arg0, %arg1 : i32, i32
  }
}

</mosaic_0001>

<bundles_post_ra>
// kernel: highway.1
= control target key start
LH: loop header
LB: loop body
LE: loop exit
PB: predicated region body
PF: predicated region fallthrough
CT: control target
= control target key end

     0   :  { %8 = vsyncpa [#allocation3], 0  ;;  %s574_s0 = inlined_call_operand.hbm [shape: f32[16,128], index: 0, kind: input, shape index: {}]   ;;  %s575_s1 = inlined_call_operand.hbm [shape: bf16[2,128,128], index: 1, kind: input, shape index: {}]   ;;  %s576_s2 = inlined_call_operand.vmem [shape: f32[2,1,128], index: 2, kind: input, shape index: {}]   ;;  %s577_s3 = inlined_call_operand.hbm [shape: f32[16,128], index: 3, kind: output, shape index: {}]  }
   0x1   :  { %9 = vsyncpa [#allocation6], 0 }
   0x2   :  { %10 = vsyncpa [#allocation4], 0  ;;  %s497_s12 = smov [#allocation2]   ;;  %s425_s16 = scalar_lea.hbm %s574_s0, 256 }
   0x3   :  { %s16_s13 = sshll.u32 %s497_s12, 4  ;;  %p426_p0 = scmp.ne.s32.totalorder %s574_s0, %s425_s16  ;;  %s17_s13 = int_to_ptr.vmem [resolvable:$true] %s16_s13 }
   0x4   :  { %p429_p1 = scmp.lt.u32.totalorder %s425_s16, %s574_s0 }
   0x6   :  { %p431_p2 = pnand %p429_p1, %p426_p0 }
   0x8   :  { %434 = shalt.err (!%p431_p2)
}
   0x9   :  { %s435_s21 = scalar_lea.vmem %s17_s13, 256  ;;  %p440_p4 = scmp.lt.s32.totalorder %s17_s13, %s17_s13 }
   0xa   :  { %p436_p3 = scmp.ne.s32.totalorder %s17_s13, %s435_s21  ;;  %p441_p5 = scmp.lt.s32.totalorder %s435_s21, %s435_s21 }
   0xc   :  { %p442_p6 = por %p441_p5, %p440_p4 }
   0xe   :  { %p443_p7 = pnand %p442_p6, %p436_p3 }
  0x10   :  { %446 = shalt.err (!%p443_p7)
}
  0x11   :  { %s498_s22 = smov 128   ;;  %s499_s23 = smov 8  }
  0x12   :  { %22 = dma.hbm_to_vmem [thread:$0]  %s574_s0, 256, %s17_s13, [#allocation3], %s498_s22, %s498_s22, %s499_s23  }
  0x13   :  { %s500_s26 = smov [#allocation5]   ;;  %s447_s30 = scalar_lea.hbm %s575_s1, 2048 }
  0x14   :  { %s28_s27 = sshll.u32 %s500_s26, 4  ;;  %p448_p8 = scmp.ne.s32.totalorder %s575_s1, %s447_s30  ;;  %s29_s27 = int_to_ptr.vmem [resolvable:$true] %s28_s27 }
  0x15   :  { %p451_p9 = scmp.lt.u32.totalorder %s447_s30, %s575_s1 }
  0x17   :  { %p453_p10 = pnand %p451_p9, %p448_p8 }
  0x19   :  { %456 = shalt.err (!%p453_p10)
}
  0x1a   :  { %s457_s8 = scalar_lea.vmem %s29_s27, 2048  ;;  %p462_p12 = scmp.lt.s32.totalorder %s29_s27, %s29_s27 }
  0x1b   :  { %p458_p11 = scmp.ne.s32.totalorder %s29_s27, %s457_s8  ;;  %p463_p13 = scmp.lt.s32.totalorder %s457_s8, %s457_s8 }
  0x1d   :  { %p464_p0 = por %p463_p13, %p462_p12 }
  0x1f   :  { %p465_p1 = pnand %p464_p0, %p458_p11 }
  0x21   :  { %468 = shalt.err (!%p465_p1)
}
  0x22   :  { %s501_s0 = smov 64   ;;  %s502_s9 = smov 4  }
  0x23   :  { %34 = dma.hbm_to_vmem [thread:$0]  %s575_s1, 2048, %s29_s27, [#allocation6], %s501_s0, %s501_s0, %s502_s9  }
  0x24   :  { %491 = dma.done.wait [#allocation3], 256  }
  0x25   :  { %492 = vsyncadd [#allocation3], 4294967040 }
  0x26   :  { %493 = dma.done.wait [#allocation6], 2048  }
  0x27   :  { %494 = vsyncadd [#allocation6], 4294965248  ;;  %v503_v0 = vmov 0.0   ;;  %vm504_vm0 = vmmov 0   ;;  %v401_v1 = vld [vmem:[#allocation5 + $0x40] sm:$0xff]   ;;  %v402_v2 = vld [vmem:[#allocation5 + $0x48] sm:$0xff]  }
  0x28   :  { %372 = vmatprep.subr.bf16.mxu1 %v503_v0  ;;  %352 = vmatprep.subr.bf16.mxu0 %v503_v0  ;;  %v406_v3 = vld [vmem:[#allocation5] sm:$0xff]   ;;  %v403_v4 = vld [vmem:[#allocation5 + $0x50] sm:$0xff]   ;;  %v408_v5 = vld [vmem:[#allocation5 + $0x8] sm:$0xff]   ;;  %s505_s15 = smov [#allocation7]  }
  0x29   :  { %388 = vmatprep.mubr.msk.bf16.mxu1 %vm504_vm0, %v503_v0  ;;  %368 = vmatprep.mubr.msk.bf16.mxu0 %vm504_vm0, %v503_v0  ;;  %v404_v6 = vld [vmem:[#allocation5 + $0x58] sm:$0xff]   ;;  %v410_v7 = vld [vmem:[#allocation5 + $0x10] sm:$0xff]   ;;  %v405_v8 = vld [vmem:[#allocation5 + $0x60] sm:$0xff]   ;;  %s300_s16 = sshll.u32 %s505_s15, 4  ;;  %s301_s16 = int_to_ptr.vmem [resolvable:$true] %s300_s16 }
  0x2a   :  { %373 = vmatpush3.bf16.msra.mxu1 %v401_v1  ;;  %353 = vmatpush3.bf16.msra.mxu0 %v406_v3  ;;  %v412_v9 = vld [vmem:[#allocation5 + $0x18] sm:$0xff]   ;;  %v407_v10 = vld [vmem:[#allocation5 + $0x68] sm:$0xff]   ;;  %v413_v11 = vld [vmem:[#allocation5 + $0x20] sm:$0xff]   ;;  %p474_p3 = scmp.lt.s32.totalorder %s301_s16, %s301_s16 }
  0x2b   :  { %374 = vmatprep.subr.bf16.mxu1 %v503_v0  ;;  %354 = vmatprep.subr.bf16.mxu0 %v503_v0  ;;  %v409_v12 = vld [vmem:[#allocation5 + $0x70] sm:$0xff]   ;;  %v414_v13 = vld [vmem:[#allocation5 + $0x28] sm:$0xff]   ;;  %v411_v14 = vld [vmem:[#allocation5 + $0x78] sm:$0xff]  }
  0x2c   :  { %v44_v15 = vld [vmem:[#allocation2] sm:$0xff]  ;;  %v45_v16 = vld [vmem:[#allocation2 + $0x8] sm:$0xff] }
  0x2d   :  { %v415_v17 = vld [vmem:[#allocation5 + $0x30] sm:$0xff]   ;;  %v46_v18 = vpack.c.bf16 %v45_v16, %v44_v15  ;;  %v416_v19 = vld [vmem:[#allocation5 + $0x38] sm:$0xff]  }
  0x2e   :  { %375 = vmatpush3.bf16.msra.mxu1 %v402_v2  ;;  %355 = vmatpush3.bf16.msra.mxu0 %v408_v5  ;;  %v323_v20 = vld [vmem:[%s576_s2 + $0x1] ss:$0 sm:$0xff]  ;;  %v313_v33 = vld [vmem:[%s576_s2] ss:$0 sm:$0xff]  ;;  %s469_s2 = scalar_lea.vmem %s301_s16, 256 }
  0x2f   :  { %376 = vmatprep.subr.bf16.mxu1 %v503_v0  ;;  %356 = vmatprep.subr.bf16.mxu0 %v503_v0  ;;  %p470_p2 = scmp.ne.s32.totalorder %s301_s16, %s469_s2  ;;  %p475_p4 = scmp.lt.s32.totalorder %s469_s2, %s469_s2 }
  0x31   :  { %p476_p5 = por %p475_p4, %p474_p3 }
  0x32   :  { %377 = vmatpush3.bf16.msra.mxu1 %v403_v4  ;;  %357 = vmatpush3.bf16.msra.mxu0 %v410_v7 }
  0x33   :  { %378 = vmatprep.subr.bf16.mxu1 %v503_v0  ;;  %358 = vmatprep.subr.bf16.mxu0 %v503_v0  ;;  %p477_p6 = pnand %p476_p5, %p470_p2 }
  0x36   :  { %379 = vmatpush3.bf16.msra.mxu1 %v404_v6  ;;  %359 = vmatpush3.bf16.msra.mxu0 %v412_v9 }
  0x37   :  { %380 = vmatprep.subr.bf16.mxu1 %v503_v0  ;;  %360 = vmatprep.subr.bf16.mxu0 %v503_v0 }
  0x3a   :  { %381 = vmatpush3.bf16.msra.mxu1 %v405_v8  ;;  %361 = vmatpush3.bf16.msra.mxu0 %v413_v11 }
  0x3b   :  { %382 = vmatprep.subr.bf16.mxu1 %v503_v0  ;;  %362 = vmatprep.subr.bf16.mxu0 %v503_v0 }
  0x3e   :  { %383 = vmatpush3.bf16.msra.mxu1 %v407_v10  ;;  %363 = vmatpush3.bf16.msra.mxu0 %v414_v13 }
  0x3f   :  { %384 = vmatprep.subr.bf16.mxu1 %v503_v0  ;;  %364 = vmatprep.subr.bf16.mxu0 %v503_v0 }
  0x42   :  { %385 = vmatpush3.bf16.msra.mxu1 %v409_v12  ;;  %365 = vmatpush3.bf16.msra.mxu0 %v415_v17 }
  0x43   :  { %386 = vmatprep.subr.bf16.mxu1 %v503_v0  ;;  %366 = vmatprep.subr.bf16.mxu0 %v503_v0 }
  0x46   :  { %387 = vmatpush3.bf16.msra.mxu1 %v411_v14  ;;  %367 = vmatpush3.bf16.msra.mxu0 %v416_v19 }
  0x49   :  { %389 = vmatmul.mubr.bf16.vlgmr.msra.gmra.mrb[0].mxu1 %v46_v18  ;;  %369 = vmatmul.mubr.bf16.vlgmr.msra.gmra.mrb[0].mxu0 %v46_v18 }
 0x11c   :  { %v266_v21 = vpop.f32.mrb[0].mxu1  ;;  %v152_v29 = vpop.f32.mrb[0].mxu0 }
 0x11d   :  { %v267_v22 = vadd.f32 %v323_v20, %v266_v21  ;;  %v390_v23 = vpop.f32.mrb[1].mxu1  ;;  %v370_v30 = vpop.f32.mrb[1].mxu0  ;;  %v153_v37 = vadd.f32 %v313_v33, %v152_v29 }
 0x11e   :  { %v269_v24 = vpop.f32.mrb[2].mxu1  ;;  %v155_v31 = vpop.f32.mrb[2].mxu0 }
 0x11f   :  { %v332_v25 = vmul.f32 -1.442695, %v267_v22  ;;  %v270_v26 = vadd.f32 %v323_v20, %v269_v24  ;;  %v391_v27 = vpop.f32.mrb[3].mxu1  ;;  %v371_v32 = vpop.f32.mrb[3].mxu0  ;;  %v273_v39 = vmax.f32 %v153_v37, 0.0  ;;  %v156_v40 = vadd.f32 %v313_v33, %v155_v31 }
 0x121   :  { %417 = vpow2.f32 %v332_v25  ;;  %v333_v28 = vmul.f32 -1.442695, %v270_v26  ;;  %v287_v41 = vsub.f32 %v273_v39, %v44_v15  ;;  %v274_v42 = vmax.f32 %v156_v40, 0.0 }
 0x123   :  { %419 = vpow2.f32 %v333_v28  ;;  %v288_v45 = vsub.f32 %v274_v42, %v45_v16 }
 0x12b   :  { %v418_v34 = vpop.eup %417 }
 0x12c   :  { %v281_v35 = vadd.f32 1.0, %v418_v34 }
 0x12d   :  { %v420_v36 = vpop.eup %419 }
 0x12e   :  { %421 = vrcp.f32 %v281_v35  ;;  %v282_v38 = vadd.f32 1.0, %v420_v36 }
 0x130   :  { %423 = vrcp.f32 %v282_v38 }
 0x138   :  { %v422_v43 = vpop.eup %421 }
 0x139   :  { %v289_v44 = vmul.f32 %v422_v43, %v287_v41 }
 0x13a   :  { %v424_v46 = vpop.eup %423 }
 0x13b   :  { %v290_v47 = vmul.f32 %v424_v46, %v288_v45  ;;  %v291_v48 = vadd.f32 %v289_v44, %v44_v15 }
 0x13d   :  { %v292_v49 = vadd.f32 %v290_v47, %v45_v16  ;;  %293 = vst [vmem:[#allocation7] sm:$0xff] %v291_v48 }
 0x13f   :  { %294 = vst [vmem:[#allocation7 + $0x8] sm:$0xff] %v292_v49 }
 0x140   :  { %480 = shalt.err (!%p477_p6)
}
 0x141   :  { %s481_s19 = scalar_lea.hbm %s577_s3, 256 }
 0x142   :  { %p482_p7 = scmp.ne.s32.totalorder %s577_s3, %s481_s19  ;;  %p485_p8 = scmp.lt.u32.totalorder %s481_s19, %s577_s3 }
 0x144   :  { %p487_p9 = pnand %p485_p8, %p482_p7 }
 0x146   :  { %490 = shalt.err (!%p487_p9)
}
 0x147   :  { %306 = dma.vmem_to_hbm [thread:$0]  %s301_s16, 256, %s577_s3, [#allocation4], %s498_s22, %s498_s22, %s499_s23  }
 0x148   :  { %495 = dma.done.wait [#allocation4], 256  }
 0x149   :  { %496 = vsyncadd [#allocation4], 4294967040 }
 0x14a   :  { %310 = vsyncpa [#allocation3], 1 }
 0x14b   :  { %311 = vsyncpa [#allocation6], 1 }
 0x14c   :  { %312 = vsyncpa [#allocation4], 1 }

</bundles_post_ra>
